<compile_context>
chip_gen: v7x
topology: tpu7x:2x2x1
jax: 0.10.0
libtpu: 0.0.40
codegen_flags: <defaults>
</compile_context>

<pallas_src>
import numpy as np
import jax
import jax.numpy as jnp
from jax.experimental import pallas as pl
from jax.experimental.pallas import tpu as pltpu


# ----------------------------------------------------------------------------
# 1-D bilinear interpolation matrices (align_corners=False, integer upscale)
# ----------------------------------------------------------------------------
def _bilinear_interp_matrix(in_size, out_size):
    scale = in_size / out_size
    A = np.zeros((out_size, in_size), dtype=np.float64)
    for i in range(out_size):
        src = (i + 0.5) * scale - 0.5
        src = max(src, 0.0)
        lo = min(int(np.floor(src)), in_size - 1)
        hi = min(lo + 1, in_size - 1)
        frac = src - lo
        A[i, lo] += 1.0 - frac
        A[i, hi] += frac
    # Rows sum to 1 -> adding the conv bias BEFORE the upsample matmuls is
    # exact.  Guard the invariant (correctness-review item).
    assert np.allclose(A.sum(axis=1), 1.0), "interp rows must sum to 1"
    return A.astype(np.float32)


_INTERP_CACHE = {}


def _get_interp_pair(H, W, up):
    key = (H, W, up)
    if key not in _INTERP_CACHE:
        a_h = jnp.asarray(_bilinear_interp_matrix(H, H * up))      # (Hout, H)
        b_w = jnp.asarray(_bilinear_interp_matrix(W, W * up).T)    # (W, Wout)
        _INTERP_CACHE[key] = (a_h, b_w)
    return _INTERP_CACHE[key]


def _pick_chunk(total, target, align):
    """Largest divisor of `total` that is a multiple of `align` and <= target,
    otherwise `total` itself (full-dim blocks are always legal)."""
    best = None
    for c in range(align, min(total, max(align, target)) + 1, align):
        if total % c == 0:
            best = c
    return best if best is not None else total


def _vmem_capacity_bytes():
    try:
        return int(pltpu.get_tpu_info().vmem_capacity_bytes)
    except Exception:
        return 64 << 20  # conservative default (v7x per-core VMEM)


# ----------------------------------------------------------------------------
# Kernels
# ----------------------------------------------------------------------------
def _make_upsample_kernel(n_par, edge_on, cout, H, W, reuse_y):
    def kernel(*refs):
        x_ref, w_ref, b_ref, ah_ref, bw_ref = refs[:5]
        if edge_on:
            op_ref, oe_ref = refs[5:7]
            rest = refs[7:]
        else:
            op_ref = refs[5]
            oe_ref = None
            rest = refs[6:]
        y_scr = rest[0] if reuse_y else None

        def conv():
            xv = x_ref[0].astype(jnp.float32)                    # (Cin, H*W)
            y = jnp.dot(w_ref[...], xv,
                        preferred_element_type=jnp.float32) + b_ref[...]
            return y.reshape(cout, H, W)

        if reuse_y:
            # 1x1 conv once per image; reused by every output-height chunk.
            @pl.when(pl.program_id(1) == 0)
            def _():
                y_scr[...] = conv()
            y3 = y_scr[...]                                       # (Cout, H, W)
        else:
            y3 = conv()

        ah = ah_ref[...]                                          # (t_h, H)
        t_h = ah.shape[0]
        # Height upsample: batched over Cout, (t_h, H) @ (H, W).
        ah_b = jnp.broadcast_to(ah[None], (cout, t_h, H))
        yh = jnp.matmul(ah_b, y3, preferred_element_type=jnp.float32)
        # Width upsample: single fat, lane-dense matmul (Cout*t_h, W)@(W, Wout).
        z = jnp.dot(yh.reshape(cout * t_h, W), bw_ref[...],
                    preferred_element_type=jnp.float32)
        wout = z.shape[-1]
        z3 = z.reshape(cout, t_h, wout)

        # Head split on the leading (non-tiled) dim -> no sublane relayout.
        op_ref[0] = z3[:n_par].astype(op_ref.dtype)
        if edge_on:
            oe_ref[0] = z3[n_par:].astype(oe_ref.dtype)

    return kernel


def _make_conv_kernel(n_par, edge_on):
    def kernel(*refs):
        x_ref, w_ref, b_ref = refs[:3]
        out_refs = refs[3:]
        xv = x_ref[0].astype(jnp.float32)                         # (Cin, t)
        y = jnp.dot(w_ref[...], xv,
                    preferred_element_type=jnp.float32) + b_ref[...]
        if edge_on:
            op_ref, oe_ref = out_refs
            # NOTE: if n_par is not a multiple of 8 this slice crosses a
            # sublane boundary (cheap relayout); acceptable for this path.
            op_ref[0] = y[:n_par].astype(op_ref.dtype)
            oe_ref[0] = y[n_par:].astype(oe_ref.dtype)
        else:
            out_refs[0][0] = y.astype(out_refs[0].dtype)
    return kernel


# ----------------------------------------------------------------------------
# Wrapper
# ----------------------------------------------------------------------------
def conv1x1_heads(x_nchw, w_fused, b_fused, *, num_parsing, edge_on, up_scale):
    """Fused 1x1-conv heads (+ optional separable bilinear upsample), NCHW.

    w_fused: (Cout, Cin)   b_fused: (Cout, 1)
    Returns a tuple of NCHW float32 arrays: (parsing,) or (parsing, edge).
    """
    N, Cin, H, W = x_nchw.shape
    Cout = w_fused.shape[0]
    n_par = num_parsing
    n_edge = Cout - n_par
    HW = H * W

    cap = _vmem_capacity_bytes()
    vmem_limit = max(32 << 20, min(cap - (4 << 20), 100 << 20))
    block_budget = vmem_limit - (2 << 20)

    x3 = x_nchw.reshape(N, Cin, HW)

    if up_scale > 1:
        Hout, Wout = H * up_scale, W * up_scale
        a_h, b_w = _get_interp_pair(H, W, up_scale)

        # VMEM estimate: fixed terms (x double-buffered, conv scratch, weights,
        # B_w) plus per-output-row terms (A_h chunk, out blocks, intermediates).
        fixed = 4 * (2 * Cin * HW + 2 * Cout * HW + 2 * Cout * Cin
                     + 2 * Cout + 2 * W * Wout)
        per_th = 4 * (2 * H + Cout * (H + W + 3 * Wout))
        t_h_max = max(8, (block_budget - fixed) // max(per_th, 1))
        t_h_target = int(min(Hout, t_h_max))
        if N == 1 and Hout >= 16:
            # Guarantee >=2 grid steps so v7x's second TensorCore is used.
            t_h_target = min(t_h_target, Hout // 2)
        t_h = _pick_chunk(Hout, t_h_target, 8)
        n_hblk = Hout // t_h
        # TODO(synk): for maps where even (Cin, H*W) x2 buffers overflow VMEM,
        # add chunking of x along H with a one-row halo for the height interp.

        # If N > 1 (or there is only one chunk) cache the conv result in a VMEM
        # scratch across the (sequential) chunk axis.  If N == 1 with several
        # chunks, recompute the (cheap) conv per chunk so the chunk axis can be
        # megacore-parallel.
        reuse_y = (N > 1) or (n_hblk == 1)
        sem = ("parallel", "arbitrary") if reuse_y else ("parallel", "parallel")
        scratch = [pltpu.VMEM((Cout, H, W), jnp.float32)] if reuse_y else []

        in_specs = [
            pl.BlockSpec((1, Cin, HW), lambda n, j: (n, 0, 0)),   # resident per image
            pl.BlockSpec((Cout, Cin), lambda n, j: (0, 0)),
            pl.BlockSpec((Cout, 1), lambda n, j: (0, 0)),
            pl.BlockSpec((t_h, H), lambda n, j: (j, 0)),
            pl.BlockSpec((W, Wout), lambda n, j: (0, 0)),
        ]
        out_shapes = [jax.ShapeDtypeStruct((N, n_par, Hout, Wout), jnp.float32)]
        out_specs = [pl.BlockSpec((1, n_par, t_h, Wout), lambda n, j: (n, 0, j, 0))]
        if edge_on:
            out_shapes.append(jax.ShapeDtypeStruct((N, n_edge, Hout, Wout), jnp.float32))
            out_specs.append(pl.BlockSpec((1, n_edge, t_h, Wout),
                                          lambda n, j: (n, 0, j, 0)))

        outs = pl.pallas_call(
            _make_upsample_kernel(n_par, edge_on, Cout, H, W, reuse_y),
            out_shape=tuple(out_shapes),
            grid_spec=pltpu.PrefetchScalarGridSpec(
                num_scalar_prefetch=0,
                grid=(N, n_hblk),
                in_specs=in_specs,
                out_specs=tuple(out_specs),
                scratch_shapes=scratch,
            ),
            compiler_params=pltpu.CompilerParams(
                dimension_semantics=sem,
                vmem_limit_bytes=vmem_limit,
            ),
        )(x3, w_fused, b_fused, a_h, b_w)
        outs = outs if isinstance(outs, (list, tuple)) else (outs,)
        return tuple(outs)

    # ---------------- no upsample: pure mem-bound 1x1 conv ------------------
    t_budget = max(128, block_budget // (4 * 2 * (Cin + 2 * max(Cout, 1))))
    t_target = int(min(HW, 8192, t_budget))
    if N == 1 and HW >= 256:
        t_target = min(t_target, HW // 2)     # >=2 steps for megacore
    t = _pick_chunk(HW, t_target, 128)
    n_c = HW // t

    in_specs = [
        pl.BlockSpec((1, Cin, t), lambda n, j: (n, 0, j)),
        pl.BlockSpec((Cout, Cin), lambda n, j: (0, 0)),
        pl.BlockSpec((Cout, 1), lambda n, j: (0, 0)),
    ]
    out_shapes = [jax.ShapeDtypeStruct((N, n_par, HW), jnp.float32)]
    out_specs = [pl.BlockSpec((1, n_par, t), lambda n, j: (n, 0, j))]
    if edge_on:
        out_shapes.append(jax.ShapeDtypeStruct((N, n_edge, HW), jnp.float32))
        out_specs.append(pl.BlockSpec((1, n_edge, t), lambda n, j: (n, 0, j)))

    outs = pl.pallas_call(
        _make_conv_kernel(n_par, edge_on),
        out_shape=tuple(out_shapes),
        grid_spec=pltpu.PrefetchScalarGridSpec(
            num_scalar_prefetch=0,
            grid=(N, n_c),
            in_specs=in_specs,
            out_specs=tuple(out_specs),
        ),
        compiler_params=pltpu.CompilerParams(
            dimension_semantics=("parallel", "parallel"),
            vmem_limit_bytes=vmem_limit,
        ),
    )(x3, w_fused, b_fused)
    outs = outs if isinstance(outs, (list, tuple)) else (outs,)
    return tuple(o.reshape(o.shape[0], o.shape[1], H, W) for o in outs)


# ----------------------------------------------------------------------------
# Module-equivalent forward
# ----------------------------------------------------------------------------
class Conv1x1OutputsPallas:
    def __init__(self, *, dim_in, spatial_in, num_parsing, edge_on, key):
        self.dim_in = dim_in[-1]
        self.spatial_in = spatial_in
        self.edge_on = edge_on
        self.num_parsing = num_parsing

        cin = self.dim_in
        k1, k2, k3, k4 = jax.random.split(key, 4)
        # Conv2d(Cin, Cout, 1) weight (Cout, Cin, 1, 1) -> matmul (Cout, Cin).
        w_cls = 0.1 * jax.random.normal(k1, (num_parsing, cin), jnp.float32)
        b_cls = 0.1 * jax.random.normal(k2, (num_parsing,), jnp.float32)
        if edge_on:
            w_edge = 0.1 * jax.random.normal(k3, (2, cin), jnp.float32)
            b_edge = 0.1 * jax.random.normal(k4, (2,), jnp.float32)
            # Fused [classify; edge] weight/bias cached once.
            self.w_fused = jnp.concatenate([w_cls, w_edge], axis=0)
            self.b_fused = jnp.concatenate([b_cls, b_edge], axis=0)[:, None]
        else:
            self.w_fused = w_cls
            self.b_fused = b_cls[:, None]

        self.dim_out = [num_parsing]
        self.spatial_out = [1.0]
        if edge_on:
            self.dim_out += [2]
            self.spatial_out += [1.0]

    def forward(self, x_list):
        x = x_list[-1]  # NCHW, last feature map
        # round() rather than int(): int(1/0.333..) would truncate to 2.
        up_scale = int(round(1.0 / self.spatial_in[0]))
        outs = conv1x1_heads(
            x, self.w_fused, self.b_fused,
            num_parsing=self.num_parsing, edge_on=self.edge_on,
            up_scale=up_scale)
        return list(outs)


if __name__ == "__main__":
    key = jax.random.PRNGKey(0)
    kx, kparams, kx2, kp2 = jax.random.split(key, 4)

    # ---- Test 1: edge_on=True, spatial_in=[0.5] -> 2x bilinear upsample ----
    N, CIN, H, W = 2, 32, 16, 16
    NUM_PARSING = 8
    UP = 2
    x = jax.random.normal(kx, (N, CIN, H, W), jnp.float32)
    module = Conv1x1OutputsPallas(dim_in=[CIN], spatial_in=[0.5],
                                  num_parsing=NUM_PARSING, edge_on=True,
                                  key=kparams)
    outs = module.forward([x])
    outs = [jax.block_until_ready(o) for o in outs]
    assert outs[0].shape == (N, NUM_PARSING, H * UP, W * UP), outs[0].shape
    assert outs[1].shape == (N, 2, H * UP, W * UP), outs[1].shape
    assert outs[0].dtype == jnp.float32 and outs[1].dtype == jnp.float32

    # numpy float64 reference: 1x1 conv + bilinear (align_corners=False)
    xs = np.asarray(x, dtype=np.float64)
    wf = np.asarray(module.w_fused, dtype=np.float64)
    bf = np.asarray(module.b_fused, dtype=np.float64).reshape(1, -1, 1, 1)
    y_ref = np.einsum("oc,nchw->nohw", wf, xs) + bf
    A_h = _bilinear_interp_matrix(H, H * UP).astype(np.float64)
    A_w = _bilinear_interp_matrix(W, W * UP).astype(np.float64)
    ref = np.einsum("ph,nchw,qw->ncpq", A_h, y_ref, A_w)
    np.testing.assert_allclose(np.asarray(outs[0]), ref[:, :NUM_PARSING],
                               rtol=5e-3, atol=5e-3)
    np.testing.assert_allclose(np.asarray(outs[1]), ref[:, NUM_PARSING:],
                               rtol=5e-3, atol=5e-3)

    # ---- Test 2: edge_on=False, spatial_in=[1.0] -> no upsample ------------
    x2 = jax.random.normal(kx2, (N, CIN, H, W), jnp.float32)
    module2 = Conv1x1OutputsPallas(dim_in=[CIN], spatial_in=[1.0],
                                   num_parsing=NUM_PARSING, edge_on=False,
                                   key=kp2)
    outs2 = module2.forward([x2])
    outs2 = [jax.block_until_ready(o) for o in outs2]
    assert len(outs2) == 1 and outs2[0].shape == (N, NUM_PARSING, H, W)
    xs2 = np.asarray(x2, dtype=np.float64)
    wf2 = np.asarray(module2.w_fused, dtype=np.float64)
    bf2 = np.asarray(module2.b_fused, dtype=np.float64).reshape(1, -1, 1, 1)
    ref2 = np.einsum("oc,nchw->nohw", wf2, xs2) + bf2
    np.testing.assert_allclose(np.asarray(outs2[0]), ref2, rtol=5e-3, atol=5e-3)

    print("KERNEL_OK")
</pallas_src>

<mosaic_0001>
module attributes {stable_mosaic.version = 11 : i64} {
  func.func @kernel(%arg0: i32, %arg1: i32, %arg2: memref<1x32x256xf32, #tpu.memory_space<vmem>>, %arg3: memref<10x32xf32, #tpu.memory_space<vmem>>, %arg4: memref<10x1xf32, #tpu.memory_space<vmem>>, %arg5: memref<32x16xf32, #tpu.memory_space<vmem>>, %arg6: memref<16x32xf32, #tpu.memory_space<vmem>>, %arg7: memref<1x8x32x32xf32, #tpu.memory_space<vmem>>, %arg8: memref<1x2x32x32xf32, #tpu.memory_space<vmem>>, %arg9: memref<10x16x16xf32, #tpu.memory_space<vmem>>) attributes {dimension_semantics = [#tpu.dimension_semantics<parallel>, #tpu.dimension_semantics<arbitrary>], iteration_bounds = array<i64: 2, 1>, scalar_prefetch = 0 : i64, scratch_operands = 1 : i64, tpu.core_type = #tpu.core_type<tc>, window_params = [{transform_indices = @transform_0, window_bounds = array<i64: 1, 32, 256>}, {pipeline_mode = #tpu.pipeline_mode<synchronous>, transform_indices = @transform_1, window_bounds = array<i64: 10, 32>}, {pipeline_mode = #tpu.pipeline_mode<synchronous>, transform_indices = @transform_2, window_bounds = array<i64: 10, 1>}, {transform_indices = @transform_3, window_bounds = array<i64: 32, 16>}, {pipeline_mode = #tpu.pipeline_mode<synchronous>, transform_indices = @transform_4, window_bounds = array<i64: 16, 32>}, {transform_indices = @transform_5, window_bounds = array<i64: 1, 8, 32, 32>}, {transform_indices = @transform_6, window_bounds = array<i64: 1, 2, 32, 32>}]} {
    %c0_i32 = arith.constant 0 : i32
    %0 = arith.cmpi eq, %arg1, %c0_i32 : i32
    %1 = arith.extui %0 : i1 to i32
    %c0_i32_0 = arith.constant 0 : i32
    %2 = arith.cmpi ne, %1, %c0_i32_0 : i32
    scf.if %2 {
      %c0_16 = arith.constant 0 : index
      %c0_17 = arith.constant 0 : index
      %c0_18 = arith.constant 0 : index
      %21 = vector.load %arg2[%c0_16, %c0_17, %c0_18] : memref<1x32x256xf32, #tpu.memory_space<vmem>>, vector<1x32x256xf32>
      %22 = vector.shape_cast %21 : vector<1x32x256xf32> to vector<32x256xf32>
      %c0_19 = arith.constant 0 : index
      %c0_20 = arith.constant 0 : index
      %23 = vector.load %arg3[%c0_19, %c0_20] : memref<10x32xf32, #tpu.memory_space<vmem>>, vector<10x32xf32>
      %cst_21 = arith.constant dense<0.000000e+00> : vector<10x256xf32>
      %24 = tpu.matmul %23, %22, %cst_21 {dimension_numbers = #tpu.dot_dimension_numbers<[1], [0], [0], [1], [0, 0, 1, 1], [], []>} : vector<10x32xf32>, vector<32x256xf32>, vector<10x256xf32> -> vector<10x256xf32>
      %c0_22 = arith.constant 0 : index
      %c0_23 = arith.constant 0 : index
      %25 = vector.load %arg4[%c0_22, %c0_23] : memref<10x1xf32, #tpu.memory_space<vmem>>, vector<10x1xf32>
      %26 = vector.broadcast %25 : vector<10x1xf32> to vector<10x256xf32>
      %27 = arith.addf %24, %26 : vector<10x256xf32>
      %28 = vector.shape_cast %27 : vector<10x256xf32> to vector<10x16x16xf32>
      %c0_24 = arith.constant 0 : index
      %c0_25 = arith.constant 0 : index
      %c0_26 = arith.constant 0 : index
      %29 = vector.load %arg9[%c0_24, %c0_25, %c0_26] : memref<10x16x16xf32, #tpu.memory_space<vmem>>, vector<10x16x16xf32>
      tpu.vector_store %arg9[%c0_24, %c0_25, %c0_26], %28 {strides = array<i32>} : memref<10x16x16xf32, #tpu.memory_space<vmem>>, vector<10x16x16xf32>,
    } else {
    }
    %c0 = arith.constant 0 : index
    %c0_1 = arith.constant 0 : index
    %c0_2 = arith.constant 0 : index
    %3 = vector.load %arg9[%c0, %c0_1, %c0_2] : memref<10x16x16xf32, #tpu.memory_space<vmem>>, vector<10x16x16xf32>
    %c0_3 = arith.constant 0 : index
    %c0_4 = arith.constant 0 : index
    %4 = vector.load %arg5[%c0_3, %c0_4] : memref<32x16xf32, #tpu.memory_space<vmem>>, vector<32x16xf32>
    %5 = vector.shape_cast %4 : vector<32x16xf32> to vector<1x32x16xf32>
    %6 = vector.shape_cast %5 : vector<1x32x16xf32> to vector<1x32x16xf32>
    %7 = vector.broadcast %6 : vector<1x32x16xf32> to vector<10x32x16xf32>
    %cst = arith.constant dense<0.000000e+00> : vector<10x32x16xf32>
    %8 = tpu.matmul %7, %3, %cst {dimension_numbers = #tpu.dot_dimension_numbers<[2], [1], [1], [2], [0, 0, 0, 1, 1, 2], [0], [0]>} : vector<10x32x16xf32>, vector<10x16x16xf32>, vector<10x32x16xf32> -> vector<10x32x16xf32>
    %9 = vector.shape_cast %8 : vector<10x32x16xf32> to vector<320x16xf32>
    %c0_5 = arith.constant 0 : index
    %c0_6 = arith.constant 0 : index
    %10 = vector.load %arg6[%c0_5, %c0_6] : memref<16x32xf32, #tpu.memory_space<vmem>>, vector<16x32xf32>
    %cst_7 = arith.constant dense<0.000000e+00> : vector<320x32xf32>
    %11 = tpu.matmul %9, %10, %cst_7 {dimension_numbers = #tpu.dot_dimension_numbers<[1], [0], [0], [1], [0, 0, 1, 1], [], []>} : vector<320x16xf32>, vector<16x32xf32>, vector<320x32xf32> -> vector<320x32xf32>
    %12 = vector.shape_cast %11 : vector<320x32xf32> to vector<10x32x32xf32>
    %13 = vector.extract_strided_slice %12 {offsets = [0, 0, 0], sizes = [8, 32, 32], strides = [1, 1, 1]} : vector<10x32x32xf32> to vector<8x32x32xf32>
    %c0_8 = arith.constant 0 : index
    %c0_9 = arith.constant 0 : index
    %c0_10 = arith.constant 0 : index
    %c0_11 = arith.constant 0 : index
    %14 = vector.load %arg7[%c0_8, %c0_9, %c0_10, %c0_11] : memref<1x8x32x32xf32, #tpu.memory_space<vmem>>, vector<1x8x32x32xf32>
    %15 = vector.shape_cast %14 : vector<1x8x32x32xf32> to vector<8x32x32xf32>
    %16 = vector.shape_cast %13 : vector<8x32x32xf32> to vector<1x8x32x32xf32>
    tpu.vector_store %arg7[%c0_8, %c0_9, %c0_10, %c0_11], %16 {strides = array<i32>} : memref<1x8x32x32xf32, #tpu.memory_space<vmem>>, vector<1x8x32x32xf32>,
    %17 = vector.extract_strided_slice %12 {offsets = [8, 0, 0], sizes = [2, 32, 32], strides = [1, 1, 1]} : vector<10x32x32xf32> to vector<2x32x32xf32>
    %c0_12 = arith.constant 0 : index
    %c0_13 = arith.constant 0 : index
    %c0_14 = arith.constant 0 : index
    %c0_15 = arith.constant 0 : index
    %18 = vector.load %arg8[%c0_12, %c0_13, %c0_14, %c0_15] : memref<1x2x32x32xf32, #tpu.memory_space<vmem>>, vector<1x2x32x32xf32>
    %19 = vector.shape_cast %18 : vector<1x2x32x32xf32> to vector<2x32x32xf32>
    %20 = vector.shape_cast %17 : vector<2x32x32xf32> to vector<1x2x32x32xf32>
    tpu.vector_store %arg8[%c0_12, %c0_13, %c0_14, %c0_15], %20 {strides = array<i32>} : memref<1x2x32x32xf32, #tpu.memory_space<vmem>>, vector<1x2x32x32xf32>,
    return
  }
  func.func @transform_0(%arg0: i32, %arg1: i32) -> (i32, i32, i32) {
    %c0_i32 = arith.constant 0 : i32
    %c0_i32_0 = arith.constant 0 : i32
    %c0_i32_1 = arith.constant 0 : i32
    return %arg0, %c0_i32, %c0_i32_0 : i32, i32, i32
  }
  func.func @transform_1(%arg0: i32, %arg1: i32) -> (i32, i32) {
    %c0_i32 = arith.constant 0 : i32
    %c0_i32_0 = arith.constant 0 : i32
    %c0_i32_1 = arith.constant 0 : i32
    return %c0_i32, %c0_i32_0 : i32, i32
  }
  func.func @transform_2(%arg0: i32, %arg1: i32) -> (i32, i32) {
    %c0_i32 = arith.constant 0 : i32
    %c0_i32_0 = arith.constant 0 : i32
    %c0_i32_1 = arith.constant 0 : i32
    return %c0_i32, %c0_i32_0 : i32, i32
  }
  func.func @transform_3(%arg0: i32, %arg1: i32) -> (i32, i32) {
    %c0_i32 = arith.constant 0 : i32
    %c0_i32_0 = arith.constant 0 : i32
    return %arg1, %c0_i32 : i32, i32
  }
  func.func @transform_4(%arg0: i32, %arg1: i32) -> (i32, i32) {
    %c0_i32 = arith.constant 0 : i32
    %c0_i32_0 = arith.constant 0 : i32
    %c0_i32_1 = arith.constant 0 : i32
    return %c0_i32, %c0_i32_0 : i32, i32
  }
  func.func @transform_5(%arg0: i32, %arg1: i32) -> (i32, i32, i32, i32) {
    %c0_i32 = arith.constant 0 : i32
    %c0_i32_0 = arith.constant 0 : i32
    %c0_i32_1 = arith.constant 0 : i32
    return %arg0, %c0_i32, %arg1, %c0_i32_0 : i32, i32, i32, i32
  }
  func.func @transform_6(%arg0: i32, %arg1: i32) -> (i32, i32, i32, i32) {
    %c0_i32 = arith.constant 0 : i32
    %c0_i32_0 = arith.constant 0 : i32
    %c0_i32_1 = arith.constant 0 : i32
    return %arg0, %c0_i32, %arg1, %c0_i32_0 : i32, i32, i32, i32
  }
}

</mosaic_0001>

<bundles_post_ra>
// kernel: tpu_custom_call.1
= control target key start
LH: loop header
LB: loop body
LE: loop exit
PB: predicated region body
PF: predicated region fallthrough
CT: control target
= control target key end

     0   :  { %12 = vsyncpa [#allocation4], 0  ;;  %s3686_s0 = inlined_call_operand.hbm [shape: f32[2,32,256], index: 0, kind: input, shape index: {}]   ;;  %s3687_s1 = inlined_call_operand.vmem [shape: f32[10,32], index: 1, kind: input, shape index: {}]   ;;  %s3688_s2 = inlined_call_operand.vmem [shape: f32[10,1], index: 2, kind: input, shape index: {}]   ;;  %s3689_s3 = inlined_call_operand.vmem [shape: f32[32,16], index: 3, kind: input, shape index: {}]   ;;  %s3690_s4 = inlined_call_operand.vmem [shape: f32[16,32], index: 4, kind: input, shape index: {}]   ;;  %s3691_s5 = inlined_call_operand.hbm [shape: f32[2,8,32,32], index: 5, kind: output, shape index: {0}]   ;;  %s3692_s6 = inlined_call_operand.hbm [shape: f32[2,2,32,32], index: 6, kind: output, shape index: {1}]  }
   0x1   :  { %14 = vsyncpa [#allocation4 + $0x1], 0 }
   0x2   :  { %15 = vsyncpa [#allocation5], 0 }
   0x3   :  { %17 = vsyncpa [#allocation5 + $0x1], 0 }
   0x4   :  { %18 = vsyncpa [#allocation8], 0 }
   0x5   :  { %20 = vsyncpa [#allocation8 + $0x1], 0  ;;  %s3107_s21 = smov 0   ;;  %s3109_s22 = smov 0  }
   0x6   :  { %s3111_s23 = smov 0   ;;  %s3113_s24 = smov 0  }
   0x7   :  { %s3115_s25 = smov 0   ;;  %s3117_s26 = smov 0  }
   0x8 LB: > { %s2400_s27 = sadd.s32 4294967295, %s3052_s26   ;;  %s2401_s28 = sadd.s32 4294967294, %s3052_s26   ;;  %s3052_s26 = sphi %s3117_s26, %s26_s26   ;;  %s3048_s25 = sphi %s3115_s25, %s3707_s25   ;;  %s3044_s24 = sphi %s3113_s24, %s3706_s24   ;;  %s3040_s23 = sphi %s3111_s23, %s3705_s23   ;;  %s3036_s22 = sphi %s3109_s22, %s3704_s22   ;;  %s3032_s21 = sphi %s3107_s21, %s3703_s21  }
   0x9   : > { %s38_s29 = sadd.s32 1, %s3048_s25  ;;  %s45_s30 = sadd.s32 1, %s3040_s23 }
   0xa   : > { %p40_p0 = scmp.ge.s32.totalorder %s38_s29, 2  ;;  %p52_p1 = scmp.ne.s32.totalorder %s3040_s23, %s3036_s22 }
   0xb   : > { %p53_p2 = scmp.eq.s32.totalorder %s3052_s26, 0  ;;  %p58_p3 = scmp.ne.s32.totalorder %s3036_s22, %s3032_s21 }
   0xc   : > { %s3709_s29 = smov (%p40_p0, %s38_s29), 0  ;;  %p59_p5 = scmp.eq.s32.totalorder %s2400_s27, 0 }
   0xd   : > { %p3148_p4 = por %p53_p2, %p52_p1  ;;  %s42_s8 = ssub.s32 %s3048_s25, %s3709_s29 }
   0xe   : > { %p173_p6 = scmp.eq.s32.totalorder %s2400_s27, 1  ;;  %p43_p7 = scmp.eq.s32.totalorder %s42_s8, 0 }
   0xf   : > { %p3154_p8 = por %p59_p5, %p58_p3  ;;  %p179_p10 = scmp.eq.s32.totalorder %s2401_s28, 1 }
  0x10   : > { %p3158_p9 = por %p173_p6, %p52_p1  ;;  %p2842_p13 = scmp.lt.s32.totalorder %s3052_s26, 2 }
  0x11   : > { %s3163_s11 = scalar_select %p43_p7, %s3040_s23, %s45_s30  }
  0x12   : > { %s3696_s10 = scalar_select %p3158_p9, 1, 0 }
  0x13   : > { %p3165_p11 = por %p179_p10, %p58_p3  ;;  %s245_s13 = sand.u32 1, %s3040_s23  }
  0x14   : > { %s2405_s14 = sshll.u32 %s245_s13, 6  ;;  %s2502_s15 = sshll.u32 %s3048_s25, 10 }
  0x15   : > { %s3697_s12 = scalar_select %p3165_p11, 1, 0 }
  0x16   : > { %s3176_s18 = scalar_lea.hbm %s3686_s0, %s2502_s15  ;;  %s249_s19 = scalar_lea.vmem [#allocation3], %s2405_s14 }
  0x17   : > { %s256_s20 = sshll.u32 %s249_s19, 4  ;;  %p3182_p0 = pnand %p2842_p13, %p3148_p4  ;;  %s3178_s20 = int_to_ptr.vmem [resolvable:$true] %s256_s20 }
  0x18   : > { %s3187_s28 = scalar_lea.sflag [#allocation4], %s245_s13  ;;  %s2908_s30 = scalar_lea.hbm %s3176_s18, 1024 }
  0x19   : > { %p2909_p2 = scmp.ne.s32.totalorder %s3176_s18, %s2908_s30  ;;  %p2910_p3 = pneg %p3182_p0 }
  0x1a   : > { %s2913_s7 = scalar_lea.hbm %s3686_s0, 2048  ;;  %p2914_p4 = scmp.lt.u32.totalorder %s3176_s18, %s3686_s0 }
  0x1b   : > { %p2911_p5 = pnand %p2910_p3, %p2909_p2  ;;  %p2915_p7 = scmp.lt.u32.totalorder %s2913_s7, %s2908_s30 }
  0x1c   : > { %p2917_p13 = scmp.lt.u32.totalorder %s2908_s30, %s3176_s18 }
  0x1d   : > { %p2912_p6 = pneg %p2911_p5  ;;  %p2916_p10 = por %p2915_p7, %p2914_p4 }
  0x1f   : > { %p2918_p12 = por %p2917_p13, %p2916_p10 }
  0x21   : > { %p2919_p1 = pnand %p2918_p12, %p2912_p6 }
  0x23   : > { %2922 = shalt.err (!%p2919_p1)
}
  0x24   : > { %s2923_s13 = scalar_lea.vmem %s3178_s20, 1024  ;;  %s3054_s17 = smov [#allocation3]  }
  0x25   : > { %p2924_p2 = scmp.ne.s32.totalorder %s3178_s20, %s2923_s13  ;;  %s2928_s19 = sshll.u32 %s3054_s17, 4  ;;  %s2929_s19 = int_to_ptr.vmem [resolvable:$false] %s2928_s19 }
  0x26   : > { %s2930_s8 = scalar_lea.vmem %s2929_s19, 2048  ;;  %p2931_p9 = scmp.lt.s32.totalorder %s3178_s20, %s2929_s19 }
  0x27   : > { %p2926_p5 = pnand %p2924_p2, %p2910_p3  ;;  %p2932_p4 = scmp.lt.s32.totalorder %s2930_s8, %s2923_s13 }
  0x29   : > { %p2927_p11 = pneg %p2926_p5  ;;  %p2933_p7 = por %p2932_p4, %p2931_p9 }
  0x2b   : > { %p2934_p10 = pnand %p2933_p7, %p2927_p11 }
  0x2d   : > { %2937 = shalt.err (!%p2934_p10)
}
  0x2e   : > { %s3055_s30 = smov 256   ;;  %s3056_s14 = smov 16  }
  0x2f   : > { %2834 = dma.hbm_to_vmem [thread:$0]  (!%p3182_p0), %s3176_s18, 1024, %s3178_s20, %s3187_s28, %s3055_s30, %s3055_s30, %s3056_s14  }
  0x30   : > { %p264_p12 = scmp.lt.s32.totalorder %s3052_s26, 3  ;;  %p3699_p1 = scmp.ge.s32.totalorder %s3052_s26, 1 }
  0x32   : > { %p265_p3 = pnand %p3699_p1, %p264_p12 }
  0x33   : > { %s3219_s7 = sand.u32 (!%p265_p3), 1, %s3036_s22  }
  0x34   : > { %268 = sbr.rel (%p265_p3) target bundleno = 963 (0x3c3), region = 40  ;;  %s2409_s15 = sshll.u32 (!%p265_p3), %s3219_s7, 6 }
  0x35   : > { %s271_s16 = scalar_lea.sflag (!%p265_p3), [#allocation4], %s3219_s7  ;;  %s274_s13 = scalar_lea.vmem (!%p265_p3), [#allocation3], %s2409_s15 }
  0x3b   : > { %3019 = dma.done.wait (%p3154_p8), %s271_s16, 1024  }
  0x3c   : > { %3021 = vsyncadd (%p3154_p8), %s271_s16, 4294966272  ;;  %v3057_v0 = vmov 0.0   ;;  %v3058_v1 = vmov 0   ;;  %v326_v2 = vld [vmem:[%s274_s13 + $0x8] sm:$0xff]  ;;  %v328_v3 = vld [vmem:[%s274_s13 + $0x18] sm:$0xff]  ;;  %vm347_vm0 = vcmask 261120   ;;  %v524_v32 = vlaneseq }
  0x3d   : > { %418 = vmatprep.mubr.f32.mxu0 %v3057_v0  ;;  %2907 = vset.pattern.permute.xlu0 %v3058_v1  ;;  %v325_v4 = vld [vmem:[%s274_s13] sm:$0xff]  ;;  %v2771_v5 = vpack.c.bf16 %v328_v3, %v326_v2  ;;  %v327_v6 = vld [vmem:[%s274_s13 + $0x10] sm:$0xff]  ;;  %v330_v7 = vld [vmem:[%s274_s13 + $0x28] sm:$0xff]  ;;  %s3059_s30 = smov 80   ;;  %s3060_s14 = smov 112   ;;  %vm891_vm1 = vcmask 130048  }
  0x3e   : > { %v332_v8 = vld [vmem:[%s274_s13 + $0x38] sm:$0xff]  ;;  %v2773_v9 = vpack.c.bf16 %v327_v6, %v325_v4  ;;  %v329_v11 = vld [vmem:[%s274_s13 + $0x20] sm:$0xff]  ;;  %v331_v12 = vld [vmem:[%s274_s13 + $0x30] sm:$0xff]  ;;  %s3061_s16 = smov 48   ;;  %s3062_s13 = smov 96   ;;  %v525_v35 = vshrl.u32 %v524_v32, 7 }
  0x3f   : > { %v2775_v10 = vpack.c.bf16 %v332_v8, %v330_v7  ;;  %2772 = vmatprep.subr.bf16.mxu0 %v2771_v5  ;;  %v335_v13 = vld [vmem:[%s3688_s2] sm:$0xff]  ;;  %v2777_v14 = vpack.c.bf16 %v331_v12, %v329_v11  ;;  %v336_v15 = vld [vmem:[%s3688_s2 + $0x8] sm:$0x3]  ;;  %s3063_s18 = smov 16   ;;  %s3064_s20 = smov 64  }
  0x40   : > { %2774 = vmatpush1.bf16.msra.mxu0 %v2773_v9  ;;  %339 = vperm.xlu0 %2907, %v335_v13   ;;  %v333_v16 = vld [vmem:[%s3687_s1] sm:$0xff]  ;;  %v334_v17 = vld [vmem:[%s3687_s1 + $0x8] sm:$0x3]  ;;  %s3065_s9 = smov 32   ;;  %v3066_v30 = vmov 1983009808  }
  0x41   : > { %2776 = vmatprep.subr.bf16.mxu0 %v2775_v10  ;;  %v3288_v28 = vld [vmem:[%s3689_s3] sm:$0xff]  ;;  %v522_v31 = vunpack.c.l.s4 %v3066_v30  ;;  %v3067_v38 = vmov 1934713408   ;;  %s2410_s27 = sshll.u32 %s3219_s7, 8  ;;  %s2503_s17 = sshll.u32 %s3044_s24, 12 }
  0x42   : > { %2611 = vmatprep.mubr.msk.f32.mxu1 %vm891_vm1, %v3288_v28  ;;  %v586_v39 = vunpack.c.l.s4 %v3067_v38  ;;  %s3516_s28 = scalar_lea.vmem [#allocation6], %s2410_s27  ;;  %p3700_p9 = scmp.ne.s32.totalorder %s3696_s10, 0 }
  0x43   : > { %v523_v34 = vunpack.c.0.s8 %v522_v31  ;;  %s2248_s19 = sshll.u32 %s3516_s28, 4  ;;  %s3585_s19 = int_to_ptr.vmem [resolvable:$true] %s2248_s19 }
  0x44   : > { %2778 = vmatpush1.bf16.msra.mxu0 %v2777_v14  ;;  %344 = vperm.xlu0 %2907, %v336_v15   ;;  %v587_v47 = vunpack.c.0.s8 %v586_v39 }
  0x45   : > { %v3305_v41 = vsub.s32 %v523_v34, %v525_v35 }
  0x46   : > { %v3312_v58 = vsub.s32 %v587_v47, %v525_v35 }
  0x47   : > { %2412 = vmatmul.mubr.msk.f32.vlgmr.msra.gmra.mrb[0].mxu0 %vm347_vm0, %v333_v16 }
  0x48   : > { %424 = vmatprep.mubr.f32.mxu0 %v3057_v0 }
  0x4b   : > { %2413 = vmatmul.mubr.msk.f32.gmra.mrb[2].mxu0 %vm347_vm0, %v334_v17 }
  0x4c   : > { %2631 = vmatprep.mubr.msk.f32.mxu0 %vm891_vm1, %v3288_v28 }
  0xbf   : > { %v340_v18 = vpop.permute.xlu0 %339 }
  0xc3   : > { %v345_v25 = vpop.permute.xlu0 %344 }
 0x11a   : > { %v420_v19 = vpop.f32.mrb[0].mxu0 }
 0x11b   : > { %v3243_v20 = vadd.f32 %v420_v19, %v340_v18  ;;  %v422_v21 = vpop.f32.mrb[1].mxu0 }
 0x11c   : > { %v3255_v24 = vadd.f32 %v422_v21, %v340_v18 }
 0x11d   : > { %445 = vrot.lane.b32.xlu0 %v3243_v20, %s3059_s30  ;;  %433 = vrot.lane.b32.xlu1 %v3243_v20, %s3060_s14 }
 0x11e   : > { %v426_v22 = vpop.f32.mrb[2].mxu0 }
 0x11f   : > { %v428_v23 = vpop.f32.mrb[3].mxu0  ;;  %v3265_v26 = vadd.f32 %v426_v22, %v345_v25 }
 0x120   : > { %v3281_v27 = vadd.f32 %v428_v23, %v345_v25 }
 0x121   : > { %457 = vrot.lane.b32.xlu0 %v3243_v20, %s3061_s16  ;;  %439 = vrot.lane.b32.xlu1 %v3243_v20, %s3062_s13 }
 0x125   : > { %469 = vrot.lane.b32.xlu0 %v3243_v20, %s3063_s18  ;;  %451 = vrot.lane.b32.xlu1 %v3243_v20, %s3064_s20 }
 0x129   : > { %483 = vrot.lane.b32.xlu0 %v3255_v24, %s3062_s13  ;;  %463 = vrot.lane.b32.xlu1 %v3243_v20, %s3065_s9 }
 0x12d   : > { %495 = vrot.lane.b32.xlu0 %v3255_v24, %s3064_s20  ;;  %477 = vrot.lane.b32.xlu1 %v3255_v24, %s3060_s14 }
 0x131   : > { %507 = vrot.lane.b32.xlu0 %v3255_v24, %s3065_s9  ;;  %489 = vrot.lane.b32.xlu1 %v3255_v24, %s3059_s30 }
 0x135   : > { %435 = vrot.lane.b32.xlu0 %v3265_v26, %s3060_s14  ;;  %501 = vrot.lane.b32.xlu1 %v3255_v24, %s3061_s16 }
 0x139   : > { %447 = vrot.lane.b32.xlu0 %v3265_v26, %s3059_s30  ;;  %513 = vrot.lane.b32.xlu1 %v3255_v24, %s3063_s18 }
 0x13d   : > { %459 = vrot.lane.b32.xlu0 %v3265_v26, %s3061_s16  ;;  %441 = vrot.lane.b32.xlu1 %v3265_v26, %s3062_s13 }
 0x141   : > { %471 = vrot.lane.b32.xlu0 %v3265_v26, %s3063_s18  ;;  %453 = vrot.lane.b32.xlu1 %v3265_v26, %s3064_s20 }
 0x145   : > { %485 = vrot.lane.b32.xlu0 %v3281_v27, %s3062_s13  ;;  %465 = vrot.lane.b32.xlu1 %v3265_v26, %s3065_s9  ;;  %s2938_s13 = scalar_lea.vmem %s3585_s19, 4096 }
 0x146   : > { %p2939_p8 = scmp.ne.s32.totalorder %s3585_s19, %s2938_s13 }
 0x148   : > { %p2940_p11 = pnand %p2939_p8, %p3700_p9 }
 0x149   : > { %497 = vrot.lane.b32.xlu0 %v3281_v27, %s3064_s20  ;;  %479 = vrot.lane.b32.xlu1 %v3281_v27, %s3060_s14  ;;  %s3583_s14 = scalar_lea.hbm %s3691_s5, %s2503_s17 }
 0x14a   : > { %p2941_p0 = pneg %p2940_p11 }
 0x14d   : > { %509 = vrot.lane.b32.xlu0 %v3281_v27, %s3065_s9  ;;  %491 = vrot.lane.b32.xlu1 %v3281_v27, %s3059_s30 }
 0x151   : > { %503 = vrot.lane.b32.xlu1 %v3281_v27, %s3061_s16  ;;  %s2228_s16 = scalar_lea.sflag [#allocation5], %s3219_s7 }
 0x155   : > { %515 = vrot.lane.b32.xlu1 %v3281_v27, %s3063_s18  ;;  %s3068_s18 = smov [#allocation6]  }
 0x156   : > { %s2942_s20 = sshll.u32 %s3068_s18, 4  ;;  %s2943_s20 = int_to_ptr.vmem [resolvable:$false] %s2942_s20 }
 0x157   : > { %s2944_s9 = scalar_lea.vmem %s2943_s20, 8192  ;;  %p2945_p6 = scmp.lt.s32.totalorder %s3585_s19, %s2943_s20 }
 0x158   : > { %p2946_p13 = scmp.lt.s32.totalorder %s2944_s9, %s2938_s13 }
 0x15a   : > { %p2947_p2 = por %p2946_p13, %p2945_p6 }
 0x15c   : > { %p2948_p5 = pnand %p2947_p2, %p2941_p0 }
 0x18f   : > { %v446_v29 = vpop.permute.xlu0 %445  ;;  %v434_v33 = vpop.permute.xlu1 %433 }
 0x190   : > { %v535_v42 = vcombine.low %v434_v33, %v446_v29  ;;  %v536_v46 = vcombine.high %v434_v33, %v446_v29 }
 0x192   : > { %v543_v51 = vrot.slane %v535_v42, %v3305_v41  ;;  %v550_v57 = vrot.slane %v536_v46, %v3305_v41 }
 0x193   : > { %v458_v36 = vpop.permute.xlu0 %457  ;;  %v440_v37 = vpop.permute.xlu1 %439 }
 0x194   : > { %v519_v40 = vcombine.low %v3243_v20, %v440_v37  ;;  %v520_v43 = vcombine.high %v3243_v20, %v440_v37 }
 0x196   : > { %v527_v48 = vrot.slane %v519_v40, %v3305_v41  ;;  %v534_v52 = vrot.slane %v520_v43, %v3305_v41 }
 0x197   : > { %v470_v44 = vpop.permute.xlu0 %469  ;;  %v452_v45 = vpop.permute.xlu1 %451 }
 0x198   : > { %v567_v49 = vcombine.low %v458_v36, %v470_v44  ;;  %v568_v50 = vcombine.high %v458_v36, %v470_v44  ;;  %v583_v59 = vcombine.low %v527_v48, %v543_v51  ;;  %v584_v60 = vcombine.high %v527_v48, %v543_v51 }
 0x199   : > { %v599_v1 = vcombine.low %v534_v52, %v550_v57  ;;  %v600_v2 = vcombine.high %v534_v52, %v550_v57 }
 0x19a   : > { %v575_v61 = vrot.slane %v567_v49, %v3305_v41  ;;  %v582_v62 = vrot.slane %v568_v50, %v3305_v41  ;;  %v591_v9 = vrot.slane %v583_v59, %v3312_v58  ;;  %v598_v10 = vrot.slane %v584_v60, %v3312_v58 }
 0x19b   : > { %v484_v53 = vpop.permute.xlu0 %483  ;;  %v464_v54 = vpop.permute.xlu1 %463  ;;  %v607_v15 = vrot.slane %v599_v1, %v3312_v58  ;;  %v614_v16 = vrot.slane %v600_v2, %v3312_v58 }
 0x19c   : > { %v551_v55 = vcombine.low %v452_v45, %v464_v54  ;;  %v552_v56 = vcombine.high %v452_v45, %v464_v54  ;;  %v655_v35 = vcombine.low %v3255_v24, %v484_v53  ;;  %v656_v36 = vcombine.high %v3255_v24, %v484_v53 }
 0x19e   : > { %v559_v63 = vrot.slane %v551_v55, %v3305_v41  ;;  %v566_v0 = vrot.slane %v552_v56, %v3305_v41  ;;  %v663_v44 = vrot.slane %v655_v35, %v3305_v41  ;;  %v670_v45 = vrot.slane %v656_v36, %v3305_v41 }
 0x19f   : > { %v496_v3 = vpop.permute.xlu0 %495  ;;  %v478_v4 = vpop.permute.xlu1 %477 }
 0x1a0   : > { %v615_v5 = vcombine.low %v559_v63, %v575_v61  ;;  %v616_v6 = vcombine.high %v559_v63, %v575_v61  ;;  %v631_v7 = vcombine.low %v566_v0, %v582_v62  ;;  %v632_v8 = vcombine.high %v566_v0, %v582_v62 }
 0x1a2   : > { %v623_v11 = vrot.slane %v615_v5, %v3312_v58  ;;  %v630_v12 = vrot.slane %v616_v6, %v3312_v58  ;;  %v639_v13 = vrot.slane %v631_v7, %v3312_v58  ;;  %v646_v14 = vrot.slane %v632_v8, %v3312_v58 }
 0x1a3   : > { %v508_v17 = vpop.permute.xlu0 %507  ;;  %v490_v18 = vpop.permute.xlu1 %489 }
 0x1a4   : > { %v647_v19 = vcombine.low %v591_v9, %v623_v11  ;;  %v648_v20 = vcombine.high %v591_v9, %v623_v11  ;;  %v649_v21 = vcombine.low %v598_v10, %v630_v12  ;;  %v650_v22 = vcombine.high %v598_v10, %v630_v12 }
 0x1a5   : > { %v651_v23 = vcombine.low %v607_v15, %v639_v13  ;;  %v652_v25 = vcombine.high %v607_v15, %v639_v13  ;;  %v653_v29 = vcombine.low %v614_v16, %v646_v14  ;;  %v654_v30 = vcombine.high %v614_v16, %v646_v14 }
 0x1a6   : > { %892 = vst.msk [vmem:[#allocation2] sm:$0xff] %vm891_vm1, %v647_v19  ;;  %894 = vst.msk [vmem:[#allocation2 + $0x10] sm:$0xff] %vm891_vm1, %v648_v20  ;;  %v671_v31 = vcombine.low %v478_v4, %v490_v18  ;;  %v672_v32 = vcombine.high %v478_v4, %v490_v18  ;;  %v687_v39 = vcombine.low %v496_v3, %v508_v17 }
 0x1a7   : > { %896 = vst.msk [vmem:[#allocation2 + $0x20] sm:$0xff] %vm891_vm1, %v649_v21  ;;  %898 = vst.msk [vmem:[#allocation2 + $0x30] sm:$0xff] %vm891_vm1, %v650_v22  ;;  %v436_v33 = vpop.permute.xlu0 %435  ;;  %v502_v34 = vpop.permute.xlu1 %501  ;;  %v688_v40 = vcombine.high %v496_v3, %v508_v17 }
 0x1a8   : > { %900 = vst.msk [vmem:[#allocation2 + $0x40] sm:$0xff] %vm891_vm1, %v651_v23  ;;  %902 = vst.msk [vmem:[#allocation2 + $0x50] sm:$0xff] %vm891_vm1, %v652_v25  ;;  %v679_v37 = vrot.slane %v671_v31, %v3305_v41  ;;  %v686_v38 = vrot.slane %v672_v32, %v3305_v41  ;;  %v695_v51 = vrot.slane %v687_v39, %v3305_v41 }
 0x1a9   : > { %904 = vst.msk [vmem:[#allocation2 + $0x60] sm:$0xff] %vm891_vm1, %v653_v29  ;;  %906 = vst.msk [vmem:[#allocation2 + $0x70] sm:$0xff] %vm891_vm1, %v654_v30  ;;  %v702_v24 = vrot.slane %v688_v40, %v3305_v41 }
 0x1aa   : > { %v719_v48 = vcombine.low %v663_v44, %v679_v37  ;;  %v720_v49 = vcombine.high %v663_v44, %v679_v37  ;;  %v735_v50 = vcombine.low %v670_v45, %v686_v38  ;;  %v736_v56 = vcombine.high %v670_v45, %v686_v38 }
 0x1ab   : > { %v448_v42 = vpop.permute.xlu0 %447  ;;  %v514_v43 = vpop.permute.xlu1 %513 }
 0x1ac   : > { %v703_v46 = vcombine.low %v502_v34, %v514_v43  ;;  %v704_v47 = vcombine.high %v502_v34, %v514_v43  ;;  %v727_v63 = vrot.slane %v719_v48, %v3312_v58  ;;  %v734_v0 = vrot.slane %v720_v49, %v3312_v58 }
 0x1ad   : > { %v743_v1 = vrot.slane %v735_v50, %v3312_v58  ;;  %v750_v7 = vrot.slane %v736_v56, %v3312_v58  ;;  %v799_v8 = vcombine.low %v436_v33, %v448_v42  ;;  %v912_v33 = vld [vmem:[#allocation2] sm:$0xff] }
 0x1ae   : > { %v711_v52 = vrot.slane %v703_v46, %v3305_v41  ;;  %v718_v53 = vrot.slane %v704_v47, %v3305_v41  ;;  %v916_v34 = vld [vmem:[#allocation2 + $0x20] sm:$0xff]  ;;  %v914_v47 = vld [vmem:[#allocation2 + $0x10] sm:$0xff] }
 0x1af   : > { %v460_v54 = vpop.permute.xlu0 %459  ;;  %v442_v55 = vpop.permute.xlu1 %441  ;;  %v806_v21 = vrot.slane %v799_v8, %v3305_v41  ;;  %v920_v48 = vld [vmem:[#allocation2 + $0x40] sm:$0xff]  ;;  %v922_v8 = vld [vmem:[#allocation2 + $0x50] sm:$0xff] }
 0x1b0   : > { %v791_v57 = vcombine.low %v3265_v26, %v442_v55  ;;  %v751_v59 = vcombine.low %v695_v51, %v711_v52  ;;  %v752_v60 = vcombine.high %v695_v51, %v711_v52  ;;  %v767_v61 = vcombine.low %v702_v24, %v718_v53 }
 0x1b1   : > { %v768_v62 = vcombine.high %v702_v24, %v718_v53  ;;  %v3372_v24 = vld [vmem:[%s3689_s3 + $0x8] sm:$0xff] }
 0x1b2   : > { %v759_v2 = vrot.slane %v751_v59, %v3312_v58  ;;  %v766_v3 = vrot.slane %v752_v60, %v3312_v58  ;;  %v775_v4 = vrot.slane %v767_v61, %v3312_v58  ;;  %v798_v9 = vrot.slane %v791_v57, %v3305_v41  ;;  %v918_v57 = vld [vmem:[#allocation2 + $0x30] sm:$0xff]  ;;  %v924_v59 = vld [vmem:[#allocation2 + $0x60] sm:$0xff] }
 0x1b3   : > { %v782_v5 = vrot.slane %v768_v62, %v3312_v58  ;;  %v472_v6 = vpop.permute.xlu0 %471  ;;  %v454_v26 = vpop.permute.xlu1 %453  ;;  %v3382_v62 = vld [vmem:[%s3689_s3 + $0x10] sm:$0xff] }
 0x1b4   : > { %v815_v10 = vcombine.low %v460_v54, %v472_v6  ;;  %v783_v11 = vcombine.low %v727_v63, %v759_v2  ;;  %v784_v12 = vcombine.high %v727_v63, %v759_v2  ;;  %v785_v13 = vcombine.low %v734_v0, %v766_v3 }
 0x1b5   : > { %v786_v14 = vcombine.high %v734_v0, %v766_v3  ;;  %v787_v15 = vcombine.low %v743_v1, %v775_v4  ;;  %v788_v16 = vcombine.high %v743_v1, %v775_v4  ;;  %v789_v17 = vcombine.low %v750_v7, %v782_v5 }
 0x1b6   : > { %v790_v18 = vcombine.high %v750_v7, %v782_v5  ;;  %893 = vst.msk [vmem:[#allocation2 + $0x8] sm:$0xff] %vm891_vm1, %v783_v11  ;;  %895 = vst.msk [vmem:[#allocation2 + $0x18] sm:$0xff] %vm891_vm1, %v784_v12  ;;  %v823_v23 = vcombine.low %v798_v9, %v806_v21  ;;  %v822_v25 = vrot.slane %v815_v10, %v3305_v41 }
 0x1b7   : > { %897 = vst.msk [vmem:[#allocation2 + $0x28] sm:$0xff] %vm891_vm1, %v785_v13  ;;  %899 = vst.msk [vmem:[#allocation2 + $0x38] sm:$0xff] %vm891_vm1, %v786_v14  ;;  %v486_v19 = vpop.permute.xlu0 %485  ;;  %v466_v20 = vpop.permute.xlu1 %465  ;;  %v926_v13 = vld [vmem:[#allocation2 + $0x70] sm:$0xff] }
 0x1b8   : > { %901 = vst.msk [vmem:[#allocation2 + $0x48] sm:$0xff] %vm891_vm1, %v787_v15  ;;  %903 = vst.msk [vmem:[#allocation2 + $0x58] sm:$0xff] %vm891_vm1, %v788_v16  ;;  %v807_v22 = vcombine.low %v454_v26, %v466_v20  ;;  %v830_v35 = vrot.slane %v823_v23, %v3312_v58  ;;  %v841_v56 = vcombine.low %v3281_v27, %v486_v19  ;;  %v3388_v27 = vld [vmem:[%s3689_s3 + $0x18] sm:$0xff]  ;;  %v1799_v15 = vld [vmem:[%s3690_s4] sm:$0xff] }
 0x1b9   : > { %905 = vst.msk [vmem:[#allocation2 + $0x68] sm:$0xff] %vm891_vm1, %v789_v17  ;;  %907 = vst.msk [vmem:[#allocation2 + $0x78] sm:$0xff] %vm891_vm1, %v790_v18  ;;  %v1800_v16 = vld [vmem:[%s3690_s4 + $0x8] sm:$0xff] }
 0x1ba   : > { %v814_v29 = vrot.slane %v807_v22, %v3305_v41  ;;  %v848_v2 = vrot.slane %v841_v56, %v3305_v41  ;;  %v2819_v23 = vpack.c.bf16 %v1800_v16, %v1799_v15 }
 0x1bb   : > { %v480_v30 = vpop.permute.xlu1 %479  ;;  %v498_v32 = vpop.permute.xlu0 %497 }
 0x1bc   : > { %v831_v31 = vcombine.low %v814_v29, %v822_v25 }
 0x1bd   : > { %v913_v37 = vld [vmem:[#allocation2 + $0x8] sm:$0xff]  ;;  %v915_v39 = vld [vmem:[#allocation2 + $0x18] sm:$0xff] }
 0x1be   : > { %v838_v36 = vrot.slane %v831_v31, %v3312_v58  ;;  %v917_v38 = vld [vmem:[#allocation2 + $0x28] sm:$0xff]  ;;  %v2779_v42 = vpack.c.bf16 %v913_v37, %v912_v33  ;;  %v2783_v49 = vpack.c.bf16 %v915_v39, %v914_v47  ;;  %v919_v52 = vld [vmem:[#allocation2 + $0x38] sm:$0xff] }
 0x1bf   : > { %v492_v40 = vpop.permute.xlu1 %491  ;;  %v2787_v43 = vpack.c.bf16 %v917_v38, %v916_v34  ;;  %v921_v44 = vld [vmem:[#allocation2 + $0x48] sm:$0xff]  ;;  %v510_v54 = vpop.permute.xlu0 %509  ;;  %v2791_v60 = vpack.c.bf16 %v919_v52, %v918_v57  ;;  %v923_v26 = vld [vmem:[#allocation2 + $0x58] sm:$0xff] }
 0x1c0   : > { %v839_v45 = vcombine.low %v830_v35, %v838_v36  ;;  %v840_v46 = vcombine.high %v830_v35, %v838_v36  ;;  %2780 = vmatprep.subr.bf16.mxu1 %v2779_v42  ;;  %v2795_v50 = vpack.c.bf16 %v921_v44, %v920_v48  ;;  %v849_v51 = vcombine.low %v480_v30, %v492_v40  ;;  %v925_v53 = vld [vmem:[#allocation2 + $0x68] sm:$0xff] }
 0x1c1   : > { %2788 = vmatprep.subr.bf16.mxu0 %v2787_v43  ;;  %2782 = vmatpush3.bf16.msra.mxu1 %v2779_v42  ;;  %v2803_v61 = vpack.c.bf16 %v925_v53, %v924_v59  ;;  %v857_v63 = vcombine.low %v498_v32, %v510_v54  ;;  %v2799_v9 = vpack.c.bf16 %v923_v26, %v922_v8 }
 0x1c2   : > { %908 = vst.msk [vmem:[#allocation2 + $0x80] sm:$0xff] %vm891_vm1, %v839_v45  ;;  %910 = vst.msk [vmem:[#allocation2 + $0x90] sm:$0xff] %vm891_vm1, %v840_v46  ;;  %2790 = vmatpush3.bf16.msra.mxu0 %v2787_v43  ;;  %2784 = vmatprep.subr.bf16.mxu1 %v2783_v49  ;;  %v856_v0 = vrot.slane %v849_v51, %v3305_v41 }
 0x1c3   : > { %2796 = vmatprep.subr.bf16.mxu0 %v2795_v50  ;;  %v504_v55 = vpop.permute.xlu1 %503  ;;  %v864_v4 = vrot.slane %v857_v63, %v3305_v41 }
 0x1c4   : > { %2612 = vmatmul.mubr.msk.f32.vlgmr.msra.gmra.mrb[0].mxu1 %vm891_vm1, %v3372_v24  ;;  %v873_v5 = vcombine.low %v848_v2, %v856_v0 }
 0x1c5   : > { %2632 = vmatmul.mubr.msk.f32.vlgmr.msra.gmra.mrb[4].mxu0 %vm891_vm1, %v3372_v24  ;;  %2786 = vmatpush3.bf16.msra.mxu1 %v2783_v49 }
 0x1c6   : > { %2798 = vmatpush3.bf16.msra.mxu0 %v2795_v50  ;;  %2792 = vmatprep.subr.bf16.mxu1 %v2791_v60  ;;  %v880_v10 = vrot.slane %v873_v5, %v3312_v58 }
 0x1c7   : > { %2804 = vmatprep.subr.bf16.mxu0 %v2803_v61  ;;  %v516_v1 = vpop.permute.xlu1 %515  ;;  %2614 = vmatprep.mubr.msk.f32.mxu1 %vm891_vm1, %v3382_v62 }
 0x1c8   : > { %2634 = vmatprep.mubr.msk.f32.mxu0 %vm891_vm1, %v3382_v62  ;;  %v865_v3 = vcombine.low %v504_v55, %v516_v1  ;;  %2615 = vmatmul.mubr.msk.f32.gmra.mrb[2].mxu1 %vm891_vm1, %v3388_v27 }
 0x1c9   : > { %2635 = vmatmul.mubr.msk.f32.gmra.mrb[6].mxu0 %vm891_vm1, %v3388_v27  ;;  %2621 = vmatprep.mubr.msk.f32.mxu1 %vm891_vm1, %v3288_v28  ;;  %v928_v17 = vld [vmem:[#allocation2 + $0x80] sm:$0xff]  ;;  %v930_v21 = vld [vmem:[#allocation2 + $0x90] sm:$0xff] }
 0x1ca   : > { %v872_v6 = vrot.slane %v865_v3, %v3305_v41  ;;  %2651 = vmatprep.mubr.msk.f32.mxu0 %vm891_vm1, %v3288_v28 }
 0x1cc   : > { %v881_v7 = vcombine.low %v864_v4, %v872_v6  ;;  %2622 = vmatmul.mubr.msk.f32.vlgmr.msra.gmra.mrb[4].mxu1 %vm891_vm1, %v3372_v24 }
 0x1cd   : > { %2652 = vmatmul.mubr.msk.f32.vlgmr.msra.gmra.mrb[8].mxu0 %vm891_vm1, %v3372_v24  ;;  %2794 = vmatpush3.bf16.msra.mxu1 %v2791_v60 }
 0x1ce   : > { %v888_v41 = vrot.slane %v881_v7, %v3312_v58  ;;  %2806 = vmatpush3.bf16.msra.mxu0 %v2803_v61  ;;  %2800 = vmatprep.subr.bf16.mxu1 %v2799_v9  ;;  %v927_v58 = vld [vmem:[#allocation2 + $0x78] sm:$0xff] }
 0x1cf   : > { %2624 = vmatprep.mubr.msk.f32.mxu1 %vm891_vm1, %v3382_v62  ;;  %2654 = vmatprep.mubr.msk.f32.mxu0 %vm891_vm1, %v3382_v62  ;;  %v2807_v14 = vpack.c.bf16 %v927_v58, %v926_v13 }
 0x1d0   : > { %v889_v11 = vcombine.low %v880_v10, %v888_v41  ;;  %v890_v12 = vcombine.high %v880_v10, %v888_v41  ;;  %2625 = vmatmul.mubr.msk.f32.gmra.mrb[6].mxu1 %vm891_vm1, %v3388_v27 }
 0x1d1   : > { %2655 = vmatmul.mubr.msk.f32.gmra.mrb[10].mxu0 %vm891_vm1, %v3388_v27  ;;  %2641 = vmatprep.mubr.msk.f32.mxu1 %vm891_vm1, %v3288_v28 }
 0x1d2   : > { %909 = vst.msk [vmem:[#allocation2 + $0x88] sm:$0xff] %vm891_vm1, %v889_v11  ;;  %911 = vst.msk [vmem:[#allocation2 + $0x98] sm:$0xff] %vm891_vm1, %v890_v12  ;;  %2671 = vmatprep.mubr.msk.f32.mxu0 %vm891_vm1, %v3288_v28 }
 0x1d4   : > { %2642 = vmatmul.mubr.msk.f32.vlgmr.msra.gmra.mrb[8].mxu1 %vm891_vm1, %v3372_v24 }
 0x1d5   : > { %2672 = vmatmul.mubr.msk.f32.vlgmr.msra.gmra.mrb[12].mxu0 %vm891_vm1, %v3372_v24  ;;  %2802 = vmatpush3.bf16.msra.mxu1 %v2799_v9 }
 0x1d6   : > { %2644 = vmatprep.mubr.msk.f32.mxu1 %vm891_vm1, %v3382_v62  ;;  %2808 = vmatprep.subr.bf16.mxu1 %v2807_v14 }
 0x1d7   : > { %2674 = vmatprep.mubr.msk.f32.mxu0 %vm891_vm1, %v3382_v62 }
 0x1d8   : > { %2645 = vmatmul.mubr.msk.f32.gmra.mrb[10].mxu1 %vm891_vm1, %v3388_v27 }
 0x1d9   : > { %v929_v18 = vld [vmem:[#allocation2 + $0x88] sm:$0xff]  ;;  %v931_v19 = vld [vmem:[#allocation2 + $0x98] sm:$0xff]  ;;  %2675 = vmatmul.mubr.msk.f32.gmra.mrb[14].mxu0 %vm891_vm1, %v3388_v27  ;;  %2661 = vmatprep.mubr.msk.f32.mxu1 %vm891_vm1, %v3288_v28 }
 0x1da   : > { %v2811_v20 = vpack.c.bf16 %v929_v18, %v928_v17  ;;  %2691 = vmatprep.mubr.msk.f32.mxu0 %vm891_vm1, %v3288_v28  ;;  %v2815_v22 = vpack.c.bf16 %v931_v19, %v930_v21 }
 0x1dc   : > { %2812 = vmatprep.subr.bf16.mxu0 %v2811_v20  ;;  %2662 = vmatmul.mubr.msk.f32.vlgmr.msra.gmra.mrb[12].mxu1 %vm891_vm1, %v3372_v24 }
 0x1dd   : > { %2814 = vmatpush3.bf16.msra.mxu0 %v2811_v20  ;;  %2810 = vmatpush3.bf16.msra.mxu1 %v2807_v14 }
 0x1de   : > { %2664 = vmatprep.mubr.msk.f32.mxu1 %vm891_vm1, %v3382_v62  ;;  %2816 = vmatprep.subr.bf16.mxu1 %v2815_v22 }
 0x1df   : > { %2820 = vmatprep.subr.bf16.mxu0 %v2819_v23 }
 0x1e0   : > { %2692 = vmatmul.mubr.msk.f32.vlgmr.msra.gmra.mrb[16].mxu0 %vm891_vm1, %v3372_v24  ;;  %2665 = vmatmul.mubr.msk.f32.gmra.mrb[14].mxu1 %vm891_vm1, %v3388_v27 }
 0x1e1   : > { %2694 = vmatprep.mubr.msk.f32.mxu0 %vm891_vm1, %v3382_v62  ;;  %2681 = vmatprep.mubr.msk.f32.mxu1 %vm891_vm1, %v3288_v28 }
 0x1e2   : > { %2822 = vmatpush3.bf16.msra.mxu0 %v2819_v23 }
 0x1e4   : > { %2695 = vmatmul.mubr.msk.f32.gmra.mrb[18].mxu0 %vm891_vm1, %v3388_v27  ;;  %2682 = vmatmul.mubr.msk.f32.vlgmr.msra.gmra.mrb[16].mxu1 %vm891_vm1, %v3372_v24 }
 0x1e5   : > { %2818 = vmatpush3.bf16.msra.mxu1 %v2815_v22  ;;  %2684 = vmatprep.mubr.msk.f32.mxu1 %vm891_vm1, %v3382_v62 }
 0x1e6   : > { %2823 = vmatprep.subr.bf16.mxu1 %v2819_v23 }
 0x1e8   : > { %2685 = vmatmul.mubr.msk.f32.gmra.mrb[18].mxu1 %vm891_vm1, %v3388_v27 }
 0x1e9   : > { %2701 = vmatprep.mubr.msk.f32.mxu1 %vm891_vm1, %v3288_v28 }
 0x1ec   : > { %2702 = vmatmul.mubr.msk.f32.vlgmr.msra.gmra.mrb[20].mxu1 %vm891_vm1, %v3372_v24 }
 0x1ed   : > { %2704 = vmatprep.mubr.msk.f32.mxu1 %vm891_vm1, %v3382_v62  ;;  %2824 = vmatpush3.bf16.msra.mxu1 %v2819_v23 }
 0x1f0   : > { %2705 = vmatmul.mubr.msk.f32.gmra.mrb[22].mxu1 %vm891_vm1, %v3388_v27 }
 0x297   : > { %v2613_v25 = vpop.f32.mrb[0].mxu1 }
 0x298   : > { %v2633_v29 = vpop.f32.mrb[4].mxu0  ;;  %v1015_v30 = vpop.f32.mrb[1].mxu1 }
 0x299   : > { %v1185_v31 = vpop.f32.mrb[5].mxu0  ;;  %2711 = vmatprep.mubr.msk.f32.mxu0 %vm891_vm1, %v1015_v30 }
 0x29a   : > { %2712 = vmatmul.mubr.msk.f32.vlgmr.msra.gmra.mrb[20].mxu0 %vm891_vm1, %v2613_v25 }
 0x29b   : > { %v2616_v32 = vpop.f32.mrb[2].mxu1 }
 0x29c   : > { %v2636_v28 = vpop.f32.mrb[6].mxu0  ;;  %v1025_v33 = vpop.f32.mrb[3].mxu1 }
 0x29d   : > { %v1195_v34 = vpop.f32.mrb[7].mxu0  ;;  %2714 = vmatprep.mubr.msk.f32.mxu0 %vm891_vm1, %v1025_v33 }
 0x29e   : > { %2715 = vmatmul.mubr.msk.f32.gmra.mrb[22].mxu0 %vm891_vm1, %v2616_v32 }
 0x29f   : > { %v2623_v35 = vpop.f32.mrb[4].mxu1 }
 0x2a0   : > { %v2653_v36 = vpop.f32.mrb[8].mxu0  ;;  %v1100_v37 = vpop.f32.mrb[5].mxu1 }
 0x2a1   : > { %v1355_v38 = vpop.f32.mrb[9].mxu0  ;;  %2717 = vmatprep.mubr.msk.f32.mxu0 %vm891_vm1, %v1100_v37 }
 0x2a2   : > { %2718 = vmatmul.mubr.msk.f32.gmra.mrb[24].mxu0 %vm891_vm1, %v2623_v35 }
 0x2a3   : > { %v2626_v39 = vpop.f32.mrb[6].mxu1 }
 0x2a4   : > { %v2656_v40 = vpop.f32.mrb[10].mxu0  ;;  %v1110_v42 = vpop.f32.mrb[7].mxu1 }
 0x2a5   : > { %v1365_v43 = vpop.f32.mrb[11].mxu0  ;;  %2720 = vmatprep.mubr.msk.f32.mxu0 %vm891_vm1, %v1110_v42 }
 0x2a6   : > { %2721 = vmatmul.mubr.msk.f32.gmra.mrb[26].mxu0 %vm891_vm1, %v2626_v39 }
 0x2a7   : > { %v2643_v44 = vpop.f32.mrb[8].mxu1  ;;  %2723 = vmatprep.mubr.msk.f32.mxu0 %vm891_vm1, %v1185_v31 }
 0x2a8   : > { %v2673_v45 = vpop.f32.mrb[12].mxu0  ;;  %v1270_v46 = vpop.f32.mrb[9].mxu1 }
 0x2a9   : > { %v1525_v47 = vpop.f32.mrb[13].mxu0 }
 0x2aa   : > { %2724 = vmatmul.mubr.msk.f32.gmra.mrb[28].mxu0 %vm891_vm1, %v2633_v29 }
 0x2ab   : > { %v2646_v48 = vpop.f32.mrb[10].mxu1  ;;  %2726 = vmatprep.mubr.msk.f32.mxu0 %vm891_vm1, %v1195_v34 }
 0x2ac   : > { %v2676_v49 = vpop.f32.mrb[14].mxu0  ;;  %v1280_v50 = vpop.f32.mrb[11].mxu1 }
 0x2ad   : > { %v1535_v51 = vpop.f32.mrb[15].mxu0 }
 0x2ae   : > { %2727 = vmatmul.mubr.msk.f32.gmra.mrb[30].mxu0 %vm891_vm1, %v2636_v28 }
 0x2af   : > { %v2663_v24 = vpop.f32.mrb[12].mxu1  ;;  %2729 = vmatprep.mubr.msk.f32.mxu0 %vm891_vm1, %v1270_v46 }
 0x2b0   : > { %v1440_v52 = vpop.f32.mrb[13].mxu1 }
 0x2b2   : > { %2730 = vmatmul.mubr.msk.f32.gmra.mrb[32].mxu0 %vm891_vm1, %v2643_v44 }
 0x2b3   : > { %v2693_v53 = vpop.f32.mrb[16].mxu0  ;;  %v2666_v54 = vpop.f32.mrb[14].mxu1  ;;  %2732 = vmatprep.mubr.msk.f32.mxu0 %vm891_vm1, %v1280_v50 }
 0x2b4   : > { %v1695_v55 = vpop.f32.mrb[17].mxu0  ;;  %v1450_v56 = vpop.f32.mrb[15].mxu1 }
 0x2b5   : > { %2744 = vmatprep.mubr.msk.f32.mxu1 %vm891_vm1, %v1450_v56 }
 0x2b6   : > { %2733 = vmatmul.mubr.msk.f32.gmra.mrb[34].mxu0 %vm891_vm1, %v2646_v48  ;;  %2745 = vmatmul.mubr.msk.f32.vlgmr.msra.gmra.mrb[24].mxu1 %vm891_vm1, %v2666_v54 }
 0x2b7   : > { %v2696_v57 = vpop.f32.mrb[18].mxu0  ;;  %2735 = vmatprep.mubr.msk.f32.mxu0 %vm891_vm1, %v1355_v38  ;;  %2747 = vmatprep.mubr.msk.f32.mxu1 %vm891_vm1, %v1525_v47  ;;  %v2683_v59 = vpop.f32.mrb[16].mxu1 }
 0x2b8   : > { %v1705_v60 = vpop.f32.mrb[19].mxu0  ;;  %v1610_v61 = vpop.f32.mrb[17].mxu1 }
 0x2ba   : > { %2736 = vmatmul.mubr.msk.f32.gmra.mrb[36].mxu0 %vm891_vm1, %v2653_v36  ;;  %2748 = vmatmul.mubr.msk.f32.gmra.mrb[26].mxu1 %vm891_vm1, %v2673_v45 }
 0x2bb   : > { %2738 = vmatprep.mubr.msk.f32.mxu0 %vm891_vm1, %v1365_v43  ;;  %2750 = vmatprep.mubr.msk.f32.mxu1 %vm891_vm1, %v1535_v51  ;;  %v2686_v62 = vpop.f32.mrb[18].mxu1 }
 0x2bc   : > { %v1620_v63 = vpop.f32.mrb[19].mxu1 }
 0x2be   : > { %2739 = vmatmul.mubr.msk.f32.gmra.mrb[38].mxu0 %vm891_vm1, %v2656_v40  ;;  %2751 = vmatmul.mubr.msk.f32.gmra.mrb[28].mxu1 %vm891_vm1, %v2676_v49 }
 0x2bf   : > { %2741 = vmatprep.mubr.msk.f32.mxu0 %vm891_vm1, %v1440_v52  ;;  %2753 = vmatprep.mubr.msk.f32.mxu1 %vm891_vm1, %v1610_v61  ;;  %v2703_v0 = vpop.f32.mrb[20].mxu1 }
 0x2c0   : > { %v1780_v27 = vpop.f32.mrb[21].mxu1 }
 0x2c2   : > { %2742 = vmatmul.mubr.msk.f32.gmra.mrb[40].mxu0 %vm891_vm1, %v2663_v24  ;;  %2754 = vmatmul.mubr.msk.f32.gmra.mrb[30].mxu1 %vm891_vm1, %v2683_v59 }
 0x2c3   : > { %2756 = vmatprep.mubr.msk.f32.mxu1 %vm891_vm1, %v1620_v63  ;;  %v2706_v1 = vpop.f32.mrb[22].mxu1 }
 0x2c4   : > { %v1790_v2 = vpop.f32.mrb[23].mxu1 }
 0x2c6   : > { %2757 = vmatmul.mubr.msk.f32.gmra.mrb[32].mxu1 %vm891_vm1, %v2686_v62 }
 0x2c7   : > { %2759 = vmatprep.mubr.msk.f32.mxu1 %vm891_vm1, %v1695_v55 }
 0x2ca   : > { %2760 = vmatmul.mubr.msk.f32.gmra.mrb[34].mxu1 %vm891_vm1, %v2693_v53 }
 0x2cb   : > { %2762 = vmatprep.mubr.msk.f32.mxu1 %vm891_vm1, %v1705_v60 }
 0x2ce   : > { %2763 = vmatmul.mubr.msk.f32.gmra.mrb[36].mxu1 %vm891_vm1, %v2696_v57 }
 0x2cf   : > { %2765 = vmatprep.mubr.msk.f32.mxu1 %vm891_vm1, %v1780_v27 }
 0x2d2   : > { %2766 = vmatmul.mubr.msk.f32.gmra.mrb[38].mxu1 %vm891_vm1, %v2703_v0 }
 0x2d3   : > { %2768 = vmatprep.mubr.msk.f32.mxu1 %vm891_vm1, %v1790_v2 }
 0x2d6   : > { %2769 = vmatmul.mubr.msk.f32.gmra.mrb[40].mxu1 %vm891_vm1, %v2706_v1 }
 0x36d   : > { %v2713_v3 = vpop.f32.mrb[20].mxu0 }
 0x36e   : > { %2188 = vst.msk [vmem:[%s3516_s28 + $0x8] sm:$0xff] %vm347_vm0, %v2713_v3  ;;  %v1987_v4 = vpop.f32.mrb[21].mxu0 }
 0x36f   : > { %2187 = vst.msk [vmem:[%s3516_s28] sm:$0xff] %vm347_vm0, %v1987_v4 }
 0x371   : > { %v2716_v5 = vpop.f32.mrb[22].mxu0 }
 0x372   : > { %2190 = vst.msk [vmem:[%s3516_s28 + $0x18] sm:$0xff] %vm347_vm0, %v2716_v5  ;;  %v1997_v6 = vpop.f32.mrb[23].mxu0 }
 0x373   : > { %2189 = vst.msk [vmem:[%s3516_s28 + $0x10] sm:$0xff] %vm347_vm0, %v1997_v6 }
 0x375   : > { %v2719_v26 = vpop.f32.mrb[24].mxu0 }
 0x376   : > { %2192 = vst.msk [vmem:[%s3516_s28 + $0x28] sm:$0xff] %vm347_vm0, %v2719_v26  ;;  %v2007_v7 = vpop.f32.mrb[25].mxu0 }
 0x377   : > { %2191 = vst.msk [vmem:[%s3516_s28 + $0x20] sm:$0xff] %vm347_vm0, %v2007_v7 }
 0x379   : > { %v2722_v8 = vpop.f32.mrb[26].mxu0 }
 0x37a   : > { %2194 = vst.msk [vmem:[%s3516_s28 + $0x38] sm:$0xff] %vm347_vm0, %v2722_v8  ;;  %v2017_v9 = vpop.f32.mrb[27].mxu0 }
 0x37b   : > { %2193 = vst.msk [vmem:[%s3516_s28 + $0x30] sm:$0xff] %vm347_vm0, %v2017_v9 }
 0x37d   : > { %v2725_v10 = vpop.f32.mrb[28].mxu0 }
 0x37e   : > { %2196 = vst.msk [vmem:[%s3516_s28 + $0x48] sm:$0xff] %vm347_vm0, %v2725_v10  ;;  %v2027_v41 = vpop.f32.mrb[29].mxu0 }
 0x37f   : > { %2195 = vst.msk [vmem:[%s3516_s28 + $0x40] sm:$0xff] %vm347_vm0, %v2027_v41 }
 0x381   : > { %v2728_v11 = vpop.f32.mrb[30].mxu0 }
 0x382   : > { %2198 = vst.msk [vmem:[%s3516_s28 + $0x58] sm:$0xff] %vm347_vm0, %v2728_v11  ;;  %v2037_v12 = vpop.f32.mrb[31].mxu0 }
 0x383   : > { %2197 = vst.msk [vmem:[%s3516_s28 + $0x50] sm:$0xff] %vm347_vm0, %v2037_v12 }
 0x385   : > { %v2731_v58 = vpop.f32.mrb[32].mxu0 }
 0x386   : > { %2200 = vst.msk [vmem:[%s3516_s28 + $0x68] sm:$0xff] %vm347_vm0, %v2731_v58  ;;  %v2047_v13 = vpop.f32.mrb[33].mxu0 }
 0x387   : > { %2199 = vst.msk [vmem:[%s3516_s28 + $0x60] sm:$0xff] %vm347_vm0, %v2047_v13 }
 0x389   : > { %v2734_v14 = vpop.f32.mrb[34].mxu0  ;;  %v2746_v15 = vpop.f32.mrb[24].mxu1 }
 0x38a   : > { %2202 = vst.msk [vmem:[%s3516_s28 + $0x78] sm:$0xff] %vm347_vm0, %v2734_v14  ;;  %2210 = vst.msk [vmem:[%s3516_s28 + $0xb8] sm:$0xff] %vm347_vm0, %v2746_v15  ;;  %v2057_v16 = vpop.f32.mrb[35].mxu0  ;;  %v2097_v17 = vpop.f32.mrb[25].mxu1 }
 0x38b   : > { %2201 = vst.msk [vmem:[%s3516_s28 + $0x70] sm:$0xff] %vm347_vm0, %v2057_v16  ;;  %2209 = vst.msk [vmem:[%s3516_s28 + $0xb0] sm:$0xff] %vm347_vm0, %v2097_v17 }
 0x38d   : > { %v2737_v18 = vpop.f32.mrb[36].mxu0  ;;  %v2749_v19 = vpop.f32.mrb[26].mxu1 }
 0x38e   : > { %2204 = vst.msk [vmem:[%s3516_s28 + $0x88] sm:$0xff] %vm347_vm0, %v2737_v18  ;;  %2212 = vst.msk [vmem:[%s3516_s28 + $0xc8] sm:$0xff] %vm347_vm0, %v2749_v19  ;;  %v2067_v20 = vpop.f32.mrb[37].mxu0  ;;  %v2107_v21 = vpop.f32.mrb[27].mxu1 }
 0x38f   : > { %2203 = vst.msk [vmem:[%s3516_s28 + $0x80] sm:$0xff] %vm347_vm0, %v2067_v20  ;;  %2211 = vst.msk [vmem:[%s3516_s28 + $0xc0] sm:$0xff] %vm347_vm0, %v2107_v21 }
 0x391   : > { %v2740_v22 = vpop.f32.mrb[38].mxu0  ;;  %v2752_v23 = vpop.f32.mrb[28].mxu1 }
 0x392   : > { %2206 = vst.msk [vmem:[%s3516_s28 + $0x98] sm:$0xff] %vm347_vm0, %v2740_v22  ;;  %2214 = vst.msk [vmem:[%s3516_s28 + $0xd8] sm:$0xff] %vm347_vm0, %v2752_v23  ;;  %v2077_v25 = vpop.f32.mrb[39].mxu0  ;;  %v2117_v29 = vpop.f32.mrb[29].mxu1 }
 0x393   : > { %2205 = vst.msk [vmem:[%s3516_s28 + $0x90] sm:$0xff] %vm347_vm0, %v2077_v25  ;;  %2213 = vst.msk [vmem:[%s3516_s28 + $0xd0] sm:$0xff] %vm347_vm0, %v2117_v29 }
 0x395   : > { %v2743_v30 = vpop.f32.mrb[40].mxu0  ;;  %v2755_v31 = vpop.f32.mrb[30].mxu1 }
 0x396   : > { %2208 = vst.msk [vmem:[%s3516_s28 + $0xa8] sm:$0xff] %vm347_vm0, %v2743_v30  ;;  %2216 = vst.msk [vmem:[%s3516_s28 + $0xe8] sm:$0xff] %vm347_vm0, %v2755_v31  ;;  %v2087_v32 = vpop.f32.mrb[41].mxu0  ;;  %v2127_v28 = vpop.f32.mrb[31].mxu1 }
 0x397   : > { %2207 = vst.msk [vmem:[%s3516_s28 + $0xa0] sm:$0xff] %vm347_vm0, %v2087_v32  ;;  %2215 = vst.msk [vmem:[%s3516_s28 + $0xe0] sm:$0xff] %vm347_vm0, %v2127_v28 }
 0x399   : > { %v2758_v33 = vpop.f32.mrb[32].mxu1 }
 0x39a   : > { %2218 = vst.msk [vmem:[%s3516_s28 + $0xf8] sm:$0xff] %vm347_vm0, %v2758_v33  ;;  %v2137_v34 = vpop.f32.mrb[33].mxu1 }
 0x39b   : > { %2217 = vst.msk [vmem:[%s3516_s28 + $0xf0] sm:$0xff] %vm347_vm0, %v2137_v34 }
 0x39c   : > { %2951 = shalt.err (!%p2948_p5)
}
 0x39d   : > { %s2952_s27 = scalar_lea.hbm %s3583_s14, 4096  ;;  %s2956_s8 = scalar_lea.hbm %s3691_s5, 8192 }
 0x39e   : > { %p2953_p4 = scmp.ne.s32.totalorder %s3583_s14, %s2952_s27  ;;  %p2957_p12 = scmp.lt.u32.totalorder %s3583_s14, %s3691_s5 }
 0x39f   : > { %p2958_p1 = scmp.lt.u32.totalorder %s2956_s8, %s2952_s27  ;;  %p2960_p8 = scmp.lt.u32.totalorder %s2952_s27, %s3583_s14 }
 0x3a0   : > { %p2954_p7 = pnand %p2953_p4, %p3700_p9 }
 0x3a1   : > { %p2959_p3 = por %p2958_p1, %p2957_p12 }
 0x3a2   : > { %p2955_p10 = pneg %p2954_p7 }
 0x3a3   : > { %p2961_p11 = por %p2960_p8, %p2959_p3 }
 0x3a5   : > { %p2962_p0 = pnand %p2961_p11, %p2955_p10 }
 0x3a7   : > { %2965 = shalt.err (!%p2962_p0)
}
 0x3a8   : > { %s3069_s13 = smov 128   ;;  %s3070_s20 = smov 8   ;;  %v2761_v35 = vpop.f32.mrb[34].mxu1 }
 0x3a9   : > { %2827 = dma.vmem_to_hbm [thread:$0]  (%p3700_p9), %s3585_s19, 4096, %s3583_s14, %s2228_s16, %s3069_s13, %s3069_s13, %s3070_s20   ;;  %v2147_v36 = vpop.f32.mrb[35].mxu1 }
 0x3aa   : > { %s312_s9 = scalar_lea.vmem [#allocation7], %s2409_s15  ;;  %v2764_v37 = vpop.f32.mrb[36].mxu1  ;;  %s2504_s19 = sshll.u32 %s3044_s24, 10 }
 0x3ab   : > { %2220 = vst.msk [vmem:[%s312_s9 + $0x8] sm:$0xff] %vm347_vm0, %v2761_v35  ;;  %2219 = vst.msk [vmem:[%s312_s9] sm:$0xff] %vm347_vm0, %v2147_v36  ;;  %v2157_v38 = vpop.f32.mrb[37].mxu1  ;;  %s2266_s27 = sshll.u32 %s312_s9, 4  ;;  %s3632_s16 = scalar_lea.hbm %s3692_s6, %s2504_s19  ;;  %s3627_s27 = int_to_ptr.vmem [resolvable:$true] %s2266_s27 }
 0x3ac   : > { %2222 = vst.msk [vmem:[%s312_s9 + $0x18] sm:$0xff] %vm347_vm0, %v2764_v37  ;;  %2221 = vst.msk [vmem:[%s312_s9 + $0x10] sm:$0xff] %vm347_vm0, %v2157_v38  ;;  %v2767_v39 = vpop.f32.mrb[38].mxu1  ;;  %s2233_s28 = scalar_lea.sflag [#allocation8], %s3219_s7  ;;  %s2966_s24 = scalar_lea.vmem %s3627_s27, 1024 }
 0x3ad   : > { %2224 = vst.msk [vmem:[%s312_s9 + $0x28] sm:$0xff] %vm347_vm0, %v2767_v39  ;;  %v2167_v40 = vpop.f32.mrb[39].mxu1  ;;  %p2967_p6 = scmp.ne.s32.totalorder %s3627_s27, %s2966_s24  ;;  %s3071_s17 = smov [#allocation7]  }
 0x3ae   : > { %2223 = vst.msk [vmem:[%s312_s9 + $0x20] sm:$0xff] %vm347_vm0, %v2167_v40  ;;  %v2770_v42 = vpop.f32.mrb[40].mxu1  ;;  %s2970_s8 = sshll.u32 %s3071_s17, 4  ;;  %s2971_s8 = int_to_ptr.vmem [resolvable:$false] %s2970_s8 }
 0x3af   : > { %2226 = vst.msk [vmem:[%s312_s9 + $0x38] sm:$0xff] %vm347_vm0, %v2770_v42  ;;  %v2177_v43 = vpop.f32.mrb[41].mxu1  ;;  %p2968_p13 = pnand %p2967_p6, %p3700_p9  ;;  %s2972_s30 = scalar_lea.vmem %s2971_s8, 2048 }
 0x3b0   : > { %2225 = vst.msk [vmem:[%s312_s9 + $0x30] sm:$0xff] %vm347_vm0, %v2177_v43  ;;  %p2973_p5 = scmp.lt.s32.totalorder %s3627_s27, %s2971_s8  ;;  %p2974_p4 = scmp.lt.s32.totalorder %s2972_s30, %s2966_s24 }
 0x3b1   : > { %p2969_p2 = pneg %p2968_p13 }
 0x3b2   : > { %p2975_p7 = por %p2974_p4, %p2973_p5 }
 0x3b4   : > { %p2976_p10 = pnand %p2975_p7, %p2969_p2 }
 0x3b6   : > { %2979 = shalt.err (!%p2976_p10)
}
 0x3b7   : > { %s2980_s18 = scalar_lea.hbm %s3632_s16, 1024  ;;  %s2984_s15 = scalar_lea.hbm %s3692_s6, 2048 }
 0x3b8   : > { %p2981_p12 = scmp.ne.s32.totalorder %s3632_s16, %s2980_s18  ;;  %p2985_p8 = scmp.lt.u32.totalorder %s3632_s16, %s3692_s6 }
 0x3b9   : > { %p2986_p11 = scmp.lt.u32.totalorder %s2984_s15, %s2980_s18  ;;  %p2988_p6 = scmp.lt.u32.totalorder %s2980_s18, %s3632_s16 }
 0x3ba   : > { %p2982_p1 = pnand %p2981_p12, %p3700_p9 }
 0x3bb   : > { %p2987_p0 = por %p2986_p11, %p2985_p8 }
 0x3bc   : > { %p2983_p3 = pneg %p2982_p1 }
 0x3bd   : > { %p2989_p13 = por %p2988_p6, %p2987_p0 }
 0x3bf   : > { %p2990_p2 = pnand %p2989_p13, %p2983_p3 }
 0x3c1   : > { %2993 = shalt.err (!%p2990_p2)
}
 0x3c2   : > { %2828 = dma.vmem_to_hbm [thread:$0]  (%p3700_p9), %s3627_s27, 1024, %s3632_s16, %s2233_s28, %s3069_s13, %s3069_s13, %s3070_s20  }
 0x3c3 PF: > { %s2281_s24 = sand.u32 1, %s3032_s21   ;;  %p3701_p5 = scmp.ne.s32.totalorder %s3697_s12, 0 }
 0x3c4   : > { %p3702_p4 = scmp.ge.s32.totalorder %s3052_s26, 2  ;;  %s2282_s8 = scalar_lea.sflag [#allocation5], %s2281_s24 }
 0x3c6   : > { %p2836_p7 = pnand %p3702_p4, %p3701_p5 }
 0x3c8   : > { %3023 = dma.done.wait (!%p2836_p7), %s2282_s8, 4096  }
 0x3c9   : > { %3025 = vsyncadd (!%p2836_p7), %s2282_s8, 4294963200  ;;  %s2291_s10 = scalar_lea.sflag [#allocation8], %s2281_s24 }
 0x3ca   : > { %3027 = dma.done.wait (!%p2836_p7), %s2291_s10, 1024  }
 0x3cb   : > { %3029 = vsyncadd (!%p2836_p7), %s2291_s10, 4294966272  ;;  %s26_s26 = sadd.s32 1, %s3052_s26   ;;  %s3703_s21 = smov %s3036_s22 }
 0x3cc   : > { %p23_p10 = scmp.ge.s32.totalorder %s26_s26, 4   ;;  %s3704_s22 = smov %s3040_s23 }
 0x3cd   : > { %s3705_s23 = smov %s3163_s11  ;;  %s3706_s24 = smov %s3048_s25 }
 0x3ce   : > { %s3707_s25 = smov %s3709_s29  ;;  %25 = sbr.rel (!%p23_p10) target bundleno = 8 (0x8), region = 109 }
 0x3d5   :  { %2296 = vsyncpa [#allocation4], 1 }
 0x3d6   :  { %2298 = vsyncpa [#allocation4 + $0x1], 1 }
 0x3d7   :  { %2299 = vsyncpa [#allocation5], 1 }
 0x3d8   :  { %2301 = vsyncpa [#allocation5 + $0x1], 1 }
 0x3d9   :  { %2302 = vsyncpa [#allocation8], 1 }
 0x3da   :  { %2304 = vsyncpa [#allocation8 + $0x1], 1 }

</bundles_post_ra>
